<compile_context>
chip_gen: v5e
topology: v5e:2x2
jax: 0.10.0
libtpu: 0.0.40
codegen_flags: <defaults>
</compile_context>

<pallas_src>
import functools

import jax
import jax.numpy as jnp
from jax.experimental import pallas as pl
from jax.experimental.pallas import tpu as pltpu


def _round_up(x, m):
    return ((x + m - 1) // m) * m


def _cdiv(a, b):
    return -(-a // b)


_TM_LADDER = (512, 256, 128, 64, 32, 16, 8)
_TN_LADDER = (512, 256, 128)
_TK_LADDER = (2048, 1024, 512, 256, 128)


def _pick_tile(dim, ladder, full_cap):
    """Pick a block size for `dim`.

    If dim <= full_cap, use the full dim as one block (legal per the
    (8,128)-or-full-dim rule) -> zero padding, zero extra HBM copies.
    Otherwise take the largest ladder entry whose round-up padding is <= dim/8;
    fall back to the entry minimizing padding (ties -> larger tile)."""
    if dim <= full_cap:
        return dim
    for t in ladder:
        if (-dim) % t <= dim // 8:
            return t
    return min(ladder, key=lambda t: ((-dim) % t, -t))


def _linear_kernel_fast(x_ref, w_ref, b_ref, o_ref, *, compute_dtype):
    # Whole reduction in one tk tile: no accumulator, no init/finalize.
    x = x_ref[...].astype(compute_dtype)
    w = w_ref[...].astype(compute_dtype)
    acc = jnp.dot(x, w, preferred_element_type=jnp.float32)
    o_ref[...] = (acc + b_ref[...]).astype(o_ref.dtype)


def _linear_kernel_acc(x_ref, w_ref, b_ref, o_ref, acc_ref, *, compute_dtype):
    # Grid = (B tiles, D_out tiles, D_in tiles); reduction axis (k) is last.
    k = pl.program_id(2)

    @pl.when(k == 0)
    def _():
        acc_ref[...] = jnp.zeros_like(acc_ref)

    x = x_ref[...].astype(compute_dtype)
    w = w_ref[...].astype(compute_dtype)
    acc_ref[...] += jnp.dot(x, w, preferred_element_type=jnp.float32)

    @pl.when(k == pl.num_programs(2) - 1)
    def _():
        # Bias added exactly once, in the finalize step.
        o_ref[...] = (acc_ref[...] + b_ref[...]).astype(o_ref.dtype)


def logreg_forward(x, weight, bias, *, use_bf16=False, max_full_k=2048):
    """Forward pass of LogReg: x @ weight.T + bias  (nn.Linear semantics).

    x:      (B, input_dim)          float32
    weight: (output_dim, input_dim) float32 (PyTorch nn.Linear layout)
    bias:   (output_dim,)           float32
    """
    B, D_in = x.shape
    D_out = weight.shape[0]
    compute_dtype = jnp.bfloat16 if use_bf16 else x.dtype

    # Pre-transpose W once in the wrapper (tiny for LogReg) -> straight MXU
    # (tk, tn) RHS tile, no per-step transpose.
    w_t = weight.T  # (D_in, D_out)

    # ---- tile selection: prefer full-dim blocks (no pad, no HBM copy) ------
    tm = _pick_tile(B, _TM_LADDER, full_cap=256)
    tn = _pick_tile(D_out, _TN_LADDER, full_cap=512)
    tk = _pick_tile(D_in, _TK_LADDER, full_cap=max_full_k)

    # v7x megacore: avoid a grid that collapses to a single step (one TC idle)
    # when the batch is big enough that splitting it is nearly free.
    if (_cdiv(B, tm) == 1 and _cdiv(D_out, tn) == 1 and _cdiv(D_in, tk) == 1
            and B >= 64):
        half = _round_up(_cdiv(B, 2), 8)
        if 2 * half - B <= max(8, B // 8):  # keep batch padding negligible
            tm = half

    B_p = _round_up(B, tm)
    N_p = _round_up(D_out, tn)
    K_p = _round_up(D_in, tk)

    # Pad only when unavoidable (dim exceeded the full-block cap and no ladder
    # tile divides it).  Typical LogReg shapes never pad X.
    if (B_p, K_p) != (B, D_in):
        x = jnp.pad(x, ((0, B_p - B), (0, K_p - D_in)))
    if (K_p, N_p) != (D_in, D_out):
        w_t = jnp.pad(w_t, ((0, K_p - D_in), (0, N_p - D_out)))
    b2d = (bias if N_p == D_out else jnp.pad(bias, (0, N_p - D_out)))
    b2d = b2d.reshape(1, N_p)

    grid_m, grid_n, grid_k = B_p // tm, N_p // tn, K_p // tk

    if grid_k == 1:
        kernel = functools.partial(_linear_kernel_fast,
                                   compute_dtype=compute_dtype)
        grid_spec = pltpu.PrefetchScalarGridSpec(
            num_scalar_prefetch=0,
            grid=(grid_m, grid_n),
            in_specs=[
                pl.BlockSpec((tm, tk), lambda i, j: (i, 0)),   # X tile
                pl.BlockSpec((tk, tn), lambda i, j: (0, j)),   # W^T tile
                pl.BlockSpec((1, tn), lambda i, j: (0, j)),    # bias tile
            ],
            out_specs=pl.BlockSpec((tm, tn), lambda i, j: (i, j)),
        )
        semantics = ("parallel", "parallel")
    else:
        kernel = functools.partial(_linear_kernel_acc,
                                   compute_dtype=compute_dtype)
        grid_spec = pltpu.PrefetchScalarGridSpec(
            num_scalar_prefetch=0,
            grid=(grid_m, grid_n, grid_k),
            in_specs=[
                pl.BlockSpec((tm, tk), lambda i, j, k: (i, k)),
                pl.BlockSpec((tk, tn), lambda i, j, k: (k, j)),
                pl.BlockSpec((1, tn), lambda i, j, k: (0, j)),
            ],
            out_specs=pl.BlockSpec((tm, tn), lambda i, j, k: (i, j)),
            scratch_shapes=[pltpu.VMEM((tm, tn), jnp.float32)],
        )
        semantics = ("parallel", "parallel", "arbitrary")

    out_p = pl.pallas_call(
        kernel,
        out_shape=jax.ShapeDtypeStruct((B_p, N_p), x.dtype),
        grid_spec=grid_spec,
        compiler_params=pltpu.CompilerParams(
            dimension_semantics=semantics,
            vmem_limit_bytes=32 * 1024 * 1024,
        ),
    )(x, w_t, b2d)

    if (B_p, N_p) != (B, D_out):
        out_p = out_p[:B, :D_out]
    return out_p


def init_logreg_params(key, input_dim, output_dim):
    # Deterministic init mimicking nn.Linear: U(-1/sqrt(in), 1/sqrt(in)).
    kw, kb = jax.random.split(key)
    bound = 1.0 / jnp.sqrt(jnp.float32(input_dim))
    weight = jax.random.uniform(
        kw, (output_dim, input_dim), jnp.float32, minval=-bound, maxval=bound)
    bias = jax.random.uniform(
        kb, (output_dim,), jnp.float32, minval=-bound, maxval=bound)
    return weight, bias


def _ref(x, w, b):
    return jnp.dot(x, w.T, precision=jax.lax.Precision.HIGHEST) + b


if __name__ == "__main__":
    # TODO(synk): fit/evaluate/predict (optimizer, cross-entropy, argmax) are
    # training/inference-side utilities, not part of the forward pass.
    key = jax.random.PRNGKey(0)
    k_x1, k_p1, k_x2, k_p2, k_x3, k_p3 = jax.random.split(key, 6)

    # 1) Primary small case (aligned dims, fast path, no padding).
    B, d_in, d_out = 8, 32, 16
    x = jax.random.normal(k_x1, (B, d_in), jnp.float32)
    w, b = init_logreg_params(k_p1, d_in, d_out)
    y = logreg_forward(x, w, b)
    jax.block_until_ready(y)
    assert y.shape == (B, d_out)
    assert jnp.allclose(y, _ref(x, w, b), atol=1e-3, rtol=1e-3)

    # 2) Unaligned dims: full-dim blocks, still no padded HBM copy of X.
    B2, d_in2, d_out2 = 70, 200, 10
    x2 = jax.random.normal(k_x2, (B2, d_in2), jnp.float32)
    w2, b2 = init_logreg_params(k_p2, d_in2, d_out2)
    y2 = logreg_forward(x2, w2, b2)
    jax.block_until_ready(y2)
    assert y2.shape == (B2, d_out2)
    assert jnp.allclose(y2, _ref(x2, w2, b2), atol=1e-3, rtol=1e-3)

    # 3) Force the K-reduction (accumulator) path at small scale.
    B3, d_in3, d_out3 = 16, 384, 16
    x3 = jax.random.normal(k_x3, (B3, d_in3), jnp.float32)
    w3, b3 = init_logreg_params(k_p3, d_in3, d_out3)
    y3 = logreg_forward(x3, w3, b3, max_full_k=128)
    jax.block_until_ready(y3)
    assert y3.shape == (B3, d_out3)
    assert jnp.allclose(y3, _ref(x3, w3, b3), atol=1e-3, rtol=1e-3)

    print("KERNEL_OK")
</pallas_src>

<mosaic_0001>
module attributes {stable_mosaic.version = 11 : i64} {
  func.func @_linear_kernel_fast(%arg0: i32, %arg1: i32, %arg2: memref<8x32xf32, #tpu.memory_space<vmem>>, %arg3: memref<32x16xf32, #tpu.memory_space<vmem>>, %arg4: memref<1x16xf32, #tpu.memory_space<vmem>>, %arg5: memref<8x16xf32, #tpu.memory_space<vmem>>) attributes {dimension_semantics = [#tpu.dimension_semantics<parallel>, #tpu.dimension_semantics<parallel>], iteration_bounds = array<i64: 1, 1>, scalar_prefetch = 0 : i64, scratch_operands = 0 : i64, tpu.core_type = #tpu.core_type<tc>, window_params = [{transform_indices = @transform_0, window_bounds = array<i64: 8, 32>}, {transform_indices = @transform_1, window_bounds = array<i64: 32, 16>}, {transform_indices = @transform_2, window_bounds = array<i64: 1, 16>}, {transform_indices = @transform_3, window_bounds = array<i64: 8, 16>}]} {
    %c0 = arith.constant 0 : index
    %c0_0 = arith.constant 0 : index
    %0 = vector.load %arg2[%c0, %c0_0] : memref<8x32xf32, #tpu.memory_space<vmem>>, vector<8x32xf32>
    %c0_1 = arith.constant 0 : index
    %c0_2 = arith.constant 0 : index
    %1 = vector.load %arg3[%c0_1, %c0_2] : memref<32x16xf32, #tpu.memory_space<vmem>>, vector<32x16xf32>
    %cst = arith.constant dense<0.000000e+00> : vector<8x16xf32>
    %2 = tpu.matmul %0, %1, %cst {dimension_numbers = #tpu.dot_dimension_numbers<[1], [0], [0], [1], [0, 0, 1, 1], [], []>} : vector<8x32xf32>, vector<32x16xf32>, vector<8x16xf32> -> vector<8x16xf32>
    %c0_3 = arith.constant 0 : index
    %c0_4 = arith.constant 0 : index
    %3 = vector.load %arg4[%c0_3, %c0_4] : memref<1x16xf32, #tpu.memory_space<vmem>>, vector<1x16xf32>
    %4 = vector.broadcast %3 : vector<1x16xf32> to vector<8x16xf32>
    %5 = arith.addf %2, %4 : vector<8x16xf32>
    %c0_5 = arith.constant 0 : index
    %c0_6 = arith.constant 0 : index
    %6 = vector.load %arg5[%c0_5, %c0_6] : memref<8x16xf32, #tpu.memory_space<vmem>>, vector<8x16xf32>
    tpu.vector_store %arg5[%c0_5, %c0_6], %5 {strides = array<i32>} : memref<8x16xf32, #tpu.memory_space<vmem>>, vector<8x16xf32>,
    return
  }
  func.func @transform_0(%arg0: i32, %arg1: i32) -> (i32, i32) {
    %c0_i32 = arith.constant 0 : i32
    %c0_i32_0 = arith.constant 0 : i32
    return %arg0, %c0_i32 : i32, i32
  }
  func.func @transform_1(%arg0: i32, %arg1: i32) -> (i32, i32) {
    %c0_i32 = arith.constant 0 : i32
    %c0_i32_0 = arith.constant 0 : i32
    return %c0_i32, %arg1 : i32, i32
  }
  func.func @transform_2(%arg0: i32, %arg1: i32) -> (i32, i32) {
    %c0_i32 = arith.constant 0 : i32
    %c0_i32_0 = arith.constant 0 : i32
    return %c0_i32, %arg1 : i32, i32
  }
  func.func @transform_3(%arg0: i32, %arg1: i32) -> (i32, i32) {
    %c0_i32 = arith.constant 0 : i32
    return %arg0, %arg1 : i32, i32
  }
}

</mosaic_0001>

<bundles_post_ra>
// kernel: tpu_custom_call.1
= control target key start
LH: loop header
LB: loop body
LE: loop exit
PB: predicated region body
PF: predicated region fallthrough
CT: control target
= control target key end

     0   :  { %s137_s0 = inlined_call_operand.vmem [shape: f32[8,32], index: 0, kind: input, shape index: {}]   ;;  %s138_s1 = inlined_call_operand.vmem [shape: f32[32,16], index: 1, kind: input, shape index: {}]   ;;  %s139_s2 = inlined_call_operand.vmem [shape: f32[1,16], index: 2, kind: input, shape index: {}]   ;;  %s140_s3 = inlined_call_operand.hbm [shape: f32[8,16], index: 3, kind: output, shape index: {}]  }
   0x1   :  { %v19_v0 = vld [vmem:[%s138_s1 + $0x18] sm:$0xff]  ;;  %v18_v1 = vld [vmem:[%s138_s1 + $0x10] sm:$0xff]  ;;  %v17_v2 = vld [vmem:[%s138_s1 + $0x8] sm:$0xff] }
   0x2   :  { %40 = vmatpush.msra.mxu0 %v19_v0 }
   0x3   :  { %8 = vsyncpa [#allocation3], 0  ;;  %v16_v3 = vld [vmem:[%s138_s1] sm:$0xff]  ;;  %vm24_vm0 = vcmask 261120   ;;  %s95_s24 = smov [#allocation2]   ;;  %s57_s28 = sshll.u32 %s140_s3, 4  ;;  %s58_s28 = int_to_ptr.hbm [resolvable:$true] %s57_s28 }
   0x4   :  { %41 = vmatpush.msra.mxu0 %v18_v1  ;;  %v15_v4 = vld [vmem:[%s137_s0] sm:$0xff]  ;;  %s55_s25 = sshll.u32 %s95_s24, 4  ;;  %vm48_vm1 = vcmask 130048   ;;  %s56_s25 = int_to_ptr.vmem [resolvable:$true] %s55_s25 }
   0x5   :  { %v68_v5 = vld [vmem:[%s139_s2] ss:$0 sm:$0xff] }
   0x6   :  { %42 = vmatpush.msra.mxu0 %v17_v2 }
   0x8   :  { %43 = vmatpush.msra.mxu0 %v16_v3 }
   0x9   :  { %66 = vmatmul.msk.f32.vlgmr.msra.gmra.mxu0 %vm24_vm0, %v15_v4 }
  0x86   :  { %v45_v6 = vpop.f32.mrf.mxu0 }
  0x87   :  { %v46_v7 = vadd.f32 %v68_v5, %v45_v6 }
  0x89   :  { %49 = vst.msk [vmem:[#allocation2] sm:$0xff] %vm48_vm1, %v46_v7 }
  0x8a   :  { %60 = dma.vmem_to_hbm [thread:$0]  %s56_s25, 128, %s58_s28, [#allocation3]  }
  0x8b   :  { %93 = dma.done.wait [#allocation3], 128  }
  0x8c   :  { %94 = vsyncadd [#allocation3], 4294967168 }
  0x8d   :  { %65 = vsyncpa [#allocation3], 1 }

</bundles_post_ra>
